<compile_context>
chip_gen: v6e
topology: v6e:2x2x1
jax: 0.10.0
libtpu: 0.0.40
codegen_flags: <defaults>
</compile_context>

<pallas_src>
import functools

import jax
import jax.numpy as jnp
import numpy as np
from jax import lax
from jax.experimental import pallas as pl
from jax.experimental.pallas import tpu as pltpu

_LANE = 128


def _round_up(x, m):
    return ((x + m - 1) // m) * m


def _pad_last(a, target):
    pad = target - a.shape[-1]
    if pad == 0:
        return a
    return jnp.pad(a, [(0, 0)] * (a.ndim - 1) + [(0, pad)])


def _pad_2d(w, rows, cols):
    return jnp.pad(w, ((0, rows - w.shape[0]), (0, cols - w.shape[1])))


def _vmem_limit_bytes():
    # Derive the scoped-VMEM limit from the chip (v5e/v6e: 128 MiB physical,
    # v7x: 64 MiB), leaving 25% headroom for compiler-managed temporaries.
    try:
        cap = int(pltpu.get_tpu_info().vmem_capacity_bytes)
    except Exception:
        cap = 64 * 1024 * 1024          # v7x-safe fallback
    return max(32 * 1024 * 1024, (cap * 3) // 4)


def _pick_batch_tile(B, NP, dmax, vmem_limit, adj_bytes, act_bytes):
    # Per-batch-element VMEM footprint of one grid step: pipelined (double-buffered)
    # adj + activation in/out tiles, plus f32 compute temporaries.
    per_b = (2 * (NP * NP * adj_bytes + 2 * NP * dmax * act_bytes)
             + 4 * NP * dmax * 4)
    budget = int(vmem_limit * 0.5)
    cap = max(1, budget // max(per_b, 1))
    if B >= 2:
        cap = min(cap, B // 2)   # keep >= 2 grid steps so megacore / both v7x TCs shard
    cap = min(cap, B)
    for cand in range(cap, 0, -1):
        if B % cand == 0:
            return cand
    return 1


def _batched_spec(bt, inner_shape):
    nd = len(inner_shape)
    return pl.BlockSpec((bt,) + tuple(inner_shape),
                        lambda g, _nd=nd: (g,) + (0,) * _nd)


def _fixed_spec(shape):
    # Constant-index blocks: Pallas skips the re-DMA between consecutive steps.
    # (pipeline_mode=pl.Buffered(1) would also halve their VMEM at large hidden dims.)
    nd = len(shape)
    return pl.BlockSpec(tuple(shape), lambda g, _nd=nd: (0,) * _nd)


# ---------------------------------------------------------------------------
# In-kernel building block: one GraphConv over a Bt-batch tile
#   aggregate (per graph), project (single fused matmul), bias, L2-normalize.
# ---------------------------------------------------------------------------
def _graph_conv(adj, h, w, b, mm_dtype, agg_first):
    bt, n_nodes, d_in = h.shape
    d_out = w.shape[1]
    w_mm = w.astype(mm_dtype)
    if agg_first:   # D_in <= D_out: aggregate nodes first, then one big projection
        t = jnp.concatenate(
            [jnp.dot(adj[i], h[i].astype(mm_dtype),
                     preferred_element_type=jnp.float32) for i in range(bt)],
            axis=0)                                                # (Bt*N, Din) f32
        y = jnp.dot(t.astype(mm_dtype), w_mm,
                    preferred_element_type=jnp.float32)            # (Bt*N, Dout)
        y = y.reshape(bt, n_nodes, d_out)
    else:           # D_out < D_in: project features first (fewer N^2 FLOPs)
        t = jnp.dot(h.reshape(bt * n_nodes, d_in).astype(mm_dtype), w_mm,
                    preferred_element_type=jnp.float32).reshape(bt, n_nodes, d_out)
        y = jnp.stack(
            [jnp.dot(adj[i], t[i].astype(mm_dtype),
                     preferred_element_type=jnp.float32) for i in range(bt)],
            axis=0)
    y = y + b
    # F.normalize clamps the norm at 1e-12 -> clamp squared norm at 1e-24;
    # rsqrt runs on the EUP slot instead of a VPU divide.
    ss = jnp.sum(y * y, axis=-1, keepdims=True)
    return y * lax.rsqrt(jnp.maximum(ss, 1e-24))


def _node_mask(n_pad, n_true):
    if n_pad == n_true:
        return None
    return lax.broadcasted_iota(jnp.int32, (n_pad, 1), 0) < n_true


# ---------------------------------------------------------------------------
# Kernel 1: conv_first -> relu   (BN stats computed in the wrapper from h1)
# ---------------------------------------------------------------------------
def _conv_first_kernel(x_ref, adj_ref, w_ref, b_ref, h_ref, *, mm_dtype, agg_first):
    y = _graph_conv(adj_ref[...], x_ref[...], w_ref[...], b_ref[...],
                    mm_dtype, agg_first)
    h_ref[...] = jnp.maximum(y, 0.0).astype(h_ref.dtype)


# ---------------------------------------------------------------------------
# Kernel 2: apply BN(h1) -> out1 (node max) ; conv_block -> relu -> h2
# ---------------------------------------------------------------------------
def _conv_block_kernel(h_ref, adj_ref, bn_ref, w_ref, b_ref,
                       h_out_ref, out_prev_ref, *, mm_dtype, agg_first, n_true):
    istd, shift = bn_ref[0], bn_ref[1]                       # (NP, 1) each
    h_bn = h_ref[...].astype(jnp.float32) * istd - shift     # BN, identity affine
    mask = _node_mask(h_bn.shape[1], n_true)
    h_max = h_bn if mask is None else jnp.where(mask, h_bn, -jnp.inf)
    out_prev_ref[...] = jnp.max(h_max, axis=1, keepdims=True)      # (Bt, 1, hp)
    y = _graph_conv(adj_ref[...], h_bn, w_ref[...], b_ref[...], mm_dtype, agg_first)
    h_out_ref[...] = jnp.maximum(y, 0.0).astype(h_out_ref.dtype)


# ---------------------------------------------------------------------------
# Kernel 3: apply BN(h2) -> out2 ; conv_last (no relu/bn) -> out3
# ---------------------------------------------------------------------------
def _conv_last_kernel(h_ref, adj_ref, bn_ref, w_ref, b_ref,
                      out_prev_ref, out_last_ref, *, mm_dtype, agg_first, n_true):
    istd, shift = bn_ref[0], bn_ref[1]
    h_bn = h_ref[...].astype(jnp.float32) * istd - shift
    mask = _node_mask(h_bn.shape[1], n_true)
    h_max = h_bn if mask is None else jnp.where(mask, h_bn, -jnp.inf)
    out_prev_ref[...] = jnp.max(h_max, axis=1, keepdims=True)      # (Bt, 1, hp)
    y = _graph_conv(adj_ref[...], h_bn, w_ref[...], b_ref[...], mm_dtype, agg_first)
    y_max = y if mask is None else jnp.where(mask, y, -jnp.inf)
    out_last_ref[...] = jnp.max(y_max, axis=1, keepdims=True)      # (Bt, 1, ep)


# ---------------------------------------------------------------------------
# Wrapper
# ---------------------------------------------------------------------------
def _bn_apply_params(h, true_feat_dim):
    # BatchNorm1d(num_nodes): stats per node channel over (batch, feature).
    # Computed from the STORED (possibly bf16-rounded) activations so stats and
    # application are exactly consistent.  Padded feature cols are zero; divide by
    # the true feature count.  Returned fused as (2, NP, 1): [istd, mean*istd].
    hf = h.astype(jnp.float32)
    count = hf.shape[0] * true_feat_dim
    s = jnp.sum(hf, axis=(0, 2))
    q = jnp.sum(hf * hf, axis=(0, 2))
    mean = s / count
    var = jnp.maximum(q / count - mean * mean, 0.0)    # biased var (training mode)
    istd = lax.rsqrt(var + 1e-5)
    shift = mean * istd
    return jnp.stack([istd, shift], axis=0)[:, :, None]


def gcn_encoder_forward(x, adj, params, mm_dtype=jnp.bfloat16):
    B, N, d_in = x.shape
    hid = params["w1"].shape[1]
    emb = params["wl"].shape[1]
    f32 = jnp.float32
    is_bf16 = jnp.dtype(mm_dtype) == jnp.dtype(jnp.bfloat16)
    act_dtype = jnp.bfloat16 if is_bf16 else f32      # inter-kernel activation storage

    dp, hp, ep = (_round_up(d, _LANE) for d in (d_in, hid, emb))
    NP = _round_up(N, 8)            # sublane-align the node axis
    # TODO(synk): for large N also pad nodes to 128 (lane-dense adj) and K-tile adj@h
    # with a VMEM accumulator so a single adj tile never exceeds v7x's 64 MiB VMEM.

    # Zero-pad features to 128 lanes and nodes to a multiple of 8 (padding is exact:
    # padded weight rows/cols and adj rows/cols are zero; node max is -inf masked).
    xp = jnp.pad(x, ((0, 0), (0, NP - N), (0, dp - d_in))).astype(mm_dtype)
    adj_p = jnp.pad(adj, ((0, 0), (0, NP - N), (0, NP - N))).astype(mm_dtype)
    w1 = _pad_2d(params["w1"], dp, hp); b1 = _pad_last(params["b1"], hp)
    wb = _pad_2d(params["wb"], hp, hp); bb = _pad_last(params["bb"], hp)
    wl = _pad_2d(params["wl"], hp, ep); bl = _pad_last(params["bl"], ep)

    vmem_limit = _vmem_limit_bytes()
    bt = _pick_batch_tile(B, NP, max(dp, hp, ep), vmem_limit,
                          jnp.dtype(mm_dtype).itemsize, jnp.dtype(act_dtype).itemsize)
    grid = (B // bt,)
    cparams = pltpu.CompilerParams(dimension_semantics=("parallel",),
                                   vmem_limit_bytes=vmem_limit)

    # ---- layer 1: conv_first -> relu -----------------------------------------
    h1 = pl.pallas_call(
        functools.partial(_conv_first_kernel, mm_dtype=mm_dtype,
                          agg_first=(dp <= hp)),
        grid=grid,
        in_specs=[_batched_spec(bt, (NP, dp)), _batched_spec(bt, (NP, NP)),
                  _fixed_spec((dp, hp)), _fixed_spec((1, hp))],
        out_specs=_batched_spec(bt, (NP, hp)),
        out_shape=jax.ShapeDtypeStruct((B, NP, hp), act_dtype),
        compiler_params=cparams,
    )(xp, adj_p, w1, b1)
    bn1 = _bn_apply_params(h1, hid)

    # ---- layer 2: BN(h1) -> out1 ; conv_block -> relu -> h2 -------------------
    h2, out1 = pl.pallas_call(
        functools.partial(_conv_block_kernel, mm_dtype=mm_dtype,
                          agg_first=True, n_true=N),
        grid=grid,
        in_specs=[_batched_spec(bt, (NP, hp)), _batched_spec(bt, (NP, NP)),
                  _fixed_spec((2, NP, 1)),
                  _fixed_spec((hp, hp)), _fixed_spec((1, hp))],
        out_specs=(_batched_spec(bt, (NP, hp)), _batched_spec(bt, (1, hp))),
        out_shape=(jax.ShapeDtypeStruct((B, NP, hp), act_dtype),
                   jax.ShapeDtypeStruct((B, 1, hp), f32)),
        compiler_params=cparams,
    )(h1, adj_p, bn1, wb, bb)
    bn2 = _bn_apply_params(h2, hid)

    # ---- layer 3: BN(h2) -> out2 ; conv_last -> out3 --------------------------
    out2, out3 = pl.pallas_call(
        functools.partial(_conv_last_kernel, mm_dtype=mm_dtype,
                          agg_first=(hp <= ep), n_true=N),
        grid=grid,
        in_specs=[_batched_spec(bt, (NP, hp)), _batched_spec(bt, (NP, NP)),
                  _fixed_spec((2, NP, 1)),
                  _fixed_spec((hp, ep)), _fixed_spec((1, ep))],
        out_specs=(_batched_spec(bt, (1, hp)), _batched_spec(bt, (1, ep))),
        out_shape=(jax.ShapeDtypeStruct((B, 1, hp), f32),
                   jax.ShapeDtypeStruct((B, 1, ep), f32)),
        compiler_params=cparams,
    )(h2, adj_p, bn2, wl, bl)

    # Prediction Linear in XLA over the whole batch (M=B instead of M=1 per step);
    # slicing off lane padding also discards the -mean*istd garbage in padded cols.
    feat = jnp.concatenate(
        [out1[:, 0, :hid], out2[:, 0, :hid], out3[:, 0, :emb]], axis=1)
    return feat.astype(f32) @ params["w_pred"] + params["b_pred"]


# ---------------------------------------------------------------------------
# Pure-JAX reference (mirrors the PyTorch forward) for the correctness check
# ---------------------------------------------------------------------------
def gcn_encoder_reference(x, adj, params):
    def graph_conv(h, w, b):
        y = jnp.einsum("bnm,bmd->bnd", adj, h)
        y = jnp.einsum("bnd,de->bne", y, w) + b
        norm = jnp.sqrt(jnp.sum(y * y, axis=-1, keepdims=True))
        return y / jnp.maximum(norm, 1e-12)

    def bn(h):
        mean = jnp.mean(h, axis=(0, 2), keepdims=True)
        var = jnp.mean((h - mean) ** 2, axis=(0, 2), keepdims=True)
        return (h - mean) / jnp.sqrt(var + 1e-5)

    h = bn(jax.nn.relu(graph_conv(x, params["w1"], params["b1"])))
    o1 = jnp.max(h, axis=1)
    h = bn(jax.nn.relu(graph_conv(h, params["wb"], params["bb"])))
    o2 = jnp.max(h, axis=1)
    h = graph_conv(h, params["wl"], params["bl"])
    o3 = jnp.max(h, axis=1)
    feat = jnp.concatenate([o1, o2, o3], axis=1)
    return feat @ params["w_pred"] + params["b_pred"]


# ---------------------------------------------------------------------------
# Deterministic parameter init (xavier_uniform with relu gain, zero biases,
# matching the module __init__; pred Linear uses a deterministic uniform).
# ---------------------------------------------------------------------------
def init_params(key, input_dim, hidden_dim, embedding_dim, label_dim):
    def xavier(k, fan_in, fan_out, gain):
        bound = gain * np.sqrt(6.0 / (fan_in + fan_out))
        return jax.random.uniform(k, (fan_in, fan_out), jnp.float32, -bound, bound)

    gain = np.sqrt(2.0)  # nn.init.calculate_gain('relu')
    k1, k2, k3, k4, k5 = jax.random.split(key, 5)
    pred_in = hidden_dim * 2 + embedding_dim
    bnd = 1.0 / np.sqrt(pred_in)
    return {
        "w1": xavier(k1, input_dim, hidden_dim, gain),
        "b1": jnp.zeros((1, hidden_dim), jnp.float32),
        "wb": xavier(k2, hidden_dim, hidden_dim, gain),
        "bb": jnp.zeros((1, hidden_dim), jnp.float32),
        "wl": xavier(k3, hidden_dim, embedding_dim, gain),
        "bl": jnp.zeros((1, embedding_dim), jnp.float32),
        "w_pred": jax.random.uniform(k4, (pred_in, label_dim), jnp.float32, -bnd, bnd),
        "b_pred": jax.random.uniform(k5, (1, label_dim), jnp.float32, -bnd, bnd),
    }


if __name__ == "__main__":
    # Small shapes consistent with the module: num_layers=3 (one conv_block layer).
    B, N, D_IN, HID, EMB, LABEL = 2, 16, 8, 32, 32, 4

    key = jax.random.PRNGKey(0)
    kx, ka, kp = jax.random.split(key, 3)
    x = jax.random.normal(kx, (B, N, D_IN), jnp.float32)
    a = jax.random.uniform(ka, (B, N, N), jnp.float32)
    adj = (a + jnp.swapaxes(a, 1, 2)) * 0.5 + jnp.eye(N)[None]   # symmetric + self-loops
    params = init_params(kp, D_IN, HID, EMB, LABEL)

    ref = jax.block_until_ready(gcn_encoder_reference(x, adj, params))

    # f32 path: tight semantic check against the PyTorch-equivalent reference.
    fwd_f32 = jax.jit(functools.partial(gcn_encoder_forward, mm_dtype=jnp.float32))
    y32 = jax.block_until_ready(fwd_f32(x, adj, params))
    assert y32.shape == (B, LABEL)
    assert float(jnp.max(jnp.abs(y32 - ref))) < 5e-3, "f32 kernel mismatch vs reference"

    # bf16 MXU + bf16 activation storage (default fast path): loose sanity check.
    fwd_bf16 = jax.jit(functools.partial(gcn_encoder_forward, mm_dtype=jnp.bfloat16))
    y16 = jax.block_until_ready(fwd_bf16(x, adj, params))
    assert y16.shape == (B, LABEL)
    assert float(jnp.max(jnp.abs(y16 - ref))) < 4e-1, "bf16 kernel drifted from reference"

    print("KERNEL_OK")
</pallas_src>

<mosaic_0001>
module attributes {stable_mosaic.version = 11 : i64} {
  func.func @_conv_block_kernel(%arg0: i32, %arg1: memref<1x16x128xf32, #tpu.memory_space<vmem>>, %arg2: memref<1x16x16xf32, #tpu.memory_space<vmem>>, %arg3: memref<2x16x1xf32, #tpu.memory_space<vmem>>, %arg4: memref<128x128xf32, #tpu.memory_space<vmem>>, %arg5: memref<1x128xf32, #tpu.memory_space<vmem>>, %arg6: memref<1x16x128xf32, #tpu.memory_space<vmem>>, %arg7: memref<1x1x128xf32, #tpu.memory_space<vmem>>) attributes {dimension_semantics = [#tpu.dimension_semantics<parallel>], iteration_bounds = array<i64: 2>, scalar_prefetch = 0 : i64, scratch_operands = 0 : i64, tpu.core_type = #tpu.core_type<tc>, window_params = [{transform_indices = @transform_0, window_bounds = array<i64: 1, 16, 128>}, {transform_indices = @transform_1, window_bounds = array<i64: 1, 16, 16>}, {pipeline_mode = #tpu.pipeline_mode<synchronous>, transform_indices = @transform_2, window_bounds = array<i64: 2, 16, 1>}, {pipeline_mode = #tpu.pipeline_mode<synchronous>, transform_indices = @transform_3, window_bounds = array<i64: 128, 128>}, {pipeline_mode = #tpu.pipeline_mode<synchronous>, transform_indices = @transform_4, window_bounds = array<i64: 1, 128>}, {transform_indices = @transform_5, window_bounds = array<i64: 1, 16, 128>}, {transform_indices = @transform_6, window_bounds = array<i64: 1, 1, 128>}]} {
    %c0 = arith.constant 0 : index
    %c0_0 = arith.constant 0 : index
    %c0_1 = arith.constant 0 : index
    %0 = vector.load %arg3[%c0, %c0_0, %c0_1] : memref<2x16x1xf32, #tpu.memory_space<vmem>>, vector<1x16x1xf32>
    %1 = vector.shape_cast %0 : vector<1x16x1xf32> to vector<16x1xf32>
    %c1 = arith.constant 1 : index
    %c0_2 = arith.constant 0 : index
    %c0_3 = arith.constant 0 : index
    %2 = vector.load %arg3[%c1, %c0_2, %c0_3] : memref<2x16x1xf32, #tpu.memory_space<vmem>>, vector<1x16x1xf32>
    %3 = vector.shape_cast %2 : vector<1x16x1xf32> to vector<16x1xf32>
    %c0_4 = arith.constant 0 : index
    %c0_5 = arith.constant 0 : index
    %c0_6 = arith.constant 0 : index
    %4 = vector.load %arg1[%c0_4, %c0_5, %c0_6] : memref<1x16x128xf32, #tpu.memory_space<vmem>>, vector<1x16x128xf32>
    %5 = vector.shape_cast %1 : vector<16x1xf32> to vector<1x16x1xf32>
    %6 = vector.broadcast %5 : vector<1x16x1xf32> to vector<1x16x128xf32>
    %7 = arith.mulf %4, %6 : vector<1x16x128xf32>
    %8 = vector.shape_cast %3 : vector<16x1xf32> to vector<1x16x1xf32>
    %9 = vector.broadcast %8 : vector<1x16x1xf32> to vector<1x16x128xf32>
    %10 = arith.subf %7, %9 : vector<1x16x128xf32>
    %cst = arith.constant dense<0xFF800000> : vector<1x128xf32>
    %11 = vector.multi_reduction <maximumf>, %10, %cst [1] : vector<1x16x128xf32> to vector<1x128xf32>
    %12 = vector.shape_cast %11 : vector<1x128xf32> to vector<1x1x128xf32>
    %c0_7 = arith.constant 0 : index
    %c0_8 = arith.constant 0 : index
    %c0_9 = arith.constant 0 : index
    %13 = vector.load %arg7[%c0_7, %c0_8, %c0_9] : memref<1x1x128xf32, #tpu.memory_space<vmem>>, vector<1x1x128xf32>
    tpu.vector_store %arg7[%c0_7, %c0_8, %c0_9], %12 {strides = array<i32>} : memref<1x1x128xf32, #tpu.memory_space<vmem>>, vector<1x1x128xf32>,
    %c0_10 = arith.constant 0 : index
    %c0_11 = arith.constant 0 : index
    %c0_12 = arith.constant 0 : index
    %14 = vector.load %arg2[%c0_10, %c0_11, %c0_12] : memref<1x16x16xf32, #tpu.memory_space<vmem>>, vector<1x16x16xf32>
    %c0_13 = arith.constant 0 : index
    %c0_14 = arith.constant 0 : index
    %15 = vector.load %arg4[%c0_13, %c0_14] : memref<128x128xf32, #tpu.memory_space<vmem>>, vector<128x128xf32>
    %c0_15 = arith.constant 0 : index
    %c0_16 = arith.constant 0 : index
    %16 = vector.load %arg5[%c0_15, %c0_16] : memref<1x128xf32, #tpu.memory_space<vmem>>, vector<1x128xf32>
    %17 = vector.shape_cast %14 : vector<1x16x16xf32> to vector<16x16xf32>
    %18 = vector.shape_cast %10 : vector<1x16x128xf32> to vector<16x128xf32>
    %cst_17 = arith.constant dense<0.000000e+00> : vector<16x128xf32>
    %19 = tpu.matmul %17, %18, %cst_17 {dimension_numbers = #tpu.dot_dimension_numbers<[1], [0], [0], [1], [0, 0, 1, 1], [], []>} : vector<16x16xf32>, vector<16x128xf32>, vector<16x128xf32> -> vector<16x128xf32>
    %cst_18 = arith.constant dense<0.000000e+00> : vector<16x128xf32>
    %20 = tpu.matmul %19, %15, %cst_18 {dimension_numbers = #tpu.dot_dimension_numbers<[1], [0], [0], [1], [0, 0, 1, 1], [], []>} : vector<16x128xf32>, vector<128x128xf32>, vector<16x128xf32> -> vector<16x128xf32>
    %21 = vector.shape_cast %20 : vector<16x128xf32> to vector<1x16x128xf32>
    %22 = vector.shape_cast %16 : vector<1x128xf32> to vector<1x1x128xf32>
    %23 = vector.broadcast %22 : vector<1x1x128xf32> to vector<1x16x128xf32>
    %24 = arith.addf %21, %23 : vector<1x16x128xf32>
    %25 = arith.mulf %24, %24 : vector<1x16x128xf32>
    %cst_19 = arith.constant dense<0.000000e+00> : vector<1x16xf32>
    %26 = vector.multi_reduction <add>, %25, %cst_19 [2] : vector<1x16x128xf32> to vector<1x16xf32>
    %27 = vector.shape_cast %26 : vector<1x16xf32> to vector<1x16x1xf32>
    %cst_20 = arith.constant 1.000000e-24 : f32
    %28 = vector.broadcast %cst_20 : f32 to vector<1x16x1xf32>
    %29 = arith.maximumf %27, %28 : vector<1x16x1xf32>
    %30 = math.rsqrt %29 : vector<1x16x1xf32>
    %31 = vector.broadcast %30 : vector<1x16x1xf32> to vector<1x16x128xf32>
    %32 = arith.mulf %24, %31 : vector<1x16x128xf32>
    %cst_21 = arith.constant 0.000000e+00 : f32
    %33 = vector.broadcast %cst_21 : f32 to vector<1x16x128xf32>
    %34 = arith.maximumf %32, %33 : vector<1x16x128xf32>
    %c0_22 = arith.constant 0 : index
    %c0_23 = arith.constant 0 : index
    %c0_24 = arith.constant 0 : index
    %35 = vector.load %arg6[%c0_22, %c0_23, %c0_24] : memref<1x16x128xf32, #tpu.memory_space<vmem>>, vector<1x16x128xf32>
    tpu.vector_store %arg6[%c0_22, %c0_23, %c0_24], %34 {strides = array<i32>} : memref<1x16x128xf32, #tpu.memory_space<vmem>>, vector<1x16x128xf32>,
    return
  }
  func.func @transform_0(%arg0: i32) -> (i32, i32, i32) {
    %c0_i32 = arith.constant 0 : i32
    %c0_i32_0 = arith.constant 0 : i32
    %c0_i32_1 = arith.constant 0 : i32
    return %arg0, %c0_i32, %c0_i32_0 : i32, i32, i32
  }
  func.func @transform_1(%arg0: i32) -> (i32, i32, i32) {
    %c0_i32 = arith.constant 0 : i32
    %c0_i32_0 = arith.constant 0 : i32
    %c0_i32_1 = arith.constant 0 : i32
    return %arg0, %c0_i32, %c0_i32_0 : i32, i32, i32
  }
  func.func @transform_2(%arg0: i32) -> (i32, i32, i32) {
    %c0_i32 = arith.constant 0 : i32
    %c0_i32_0 = arith.constant 0 : i32
    %c0_i32_1 = arith.constant 0 : i32
    %c0_i32_2 = arith.constant 0 : i32
    return %c0_i32, %c0_i32_0, %c0_i32_1 : i32, i32, i32
  }
  func.func @transform_3(%arg0: i32) -> (i32, i32) {
    %c0_i32 = arith.constant 0 : i32
    %c0_i32_0 = arith.constant 0 : i32
    %c0_i32_1 = arith.constant 0 : i32
    return %c0_i32, %c0_i32_0 : i32, i32
  }
  func.func @transform_4(%arg0: i32) -> (i32, i32) {
    %c0_i32 = arith.constant 0 : i32
    %c0_i32_0 = arith.constant 0 : i32
    %c0_i32_1 = arith.constant 0 : i32
    return %c0_i32, %c0_i32_0 : i32, i32
  }
  func.func @transform_5(%arg0: i32) -> (i32, i32, i32) {
    %c0_i32 = arith.constant 0 : i32
    %c0_i32_0 = arith.constant 0 : i32
    %c0_i32_1 = arith.constant 0 : i32
    return %arg0, %c0_i32, %c0_i32_0 : i32, i32, i32
  }
  func.func @transform_6(%arg0: i32) -> (i32, i32, i32) {
    %c0_i32 = arith.constant 0 : i32
    %c0_i32_0 = arith.constant 0 : i32
    %c0_i32_1 = arith.constant 0 : i32
    return %arg0, %c0_i32, %c0_i32_0 : i32, i32, i32
  }
}

module attributes {stable_mosaic.version = 11 : i64} {
  func.func @_conv_last_kernel(%arg0: i32, %arg1: memref<1x16x128xf32, #tpu.memory_space<vmem>>, %arg2: memref<1x16x16xf32, #tpu.memory_space<vmem>>, %arg3: memref<2x16x1xf32, #tpu.memory_space<vmem>>, %arg4: memref<128x128xf32, #tpu.memory_space<vmem>>, %arg5: memref<1x128xf32, #tpu.memory_space<vmem>>, %arg6: memref<1x1x128xf32, #tpu.memory_space<vmem>>, %arg7: memref<1x1x128xf32, #tpu.memory_space<vmem>>) attributes {dimension_semantics = [#tpu.dimension_semantics<parallel>], iteration_bounds = array<i64: 2>, scalar_prefetch = 0 : i64, scratch_operands = 0 : i64, tpu.core_type = #tpu.core_type<tc>, window_params = [{transform_indices = @transform_0, window_bounds = array<i64: 1, 16, 128>}, {transform_indices = @transform_1, window_bounds = array<i64: 1, 16, 16>}, {pipeline_mode = #tpu.pipeline_mode<synchronous>, transform_indices = @transform_2, window_bounds = array<i64: 2, 16, 1>}, {pipeline_mode = #tpu.pipeline_mode<synchronous>, transform_indices = @transform_3, window_bounds = array<i64: 128, 128>}, {pipeline_mode = #tpu.pipeline_mode<synchronous>, transform_indices = @transform_4, window_bounds = array<i64: 1, 128>}, {transform_indices = @transform_5, window_bounds = array<i64: 1, 1, 128>}, {transform_indices = @transform_6, window_bounds = array<i64: 1, 1, 128>}]} {
    %c0 = arith.constant 0 : index
    %c0_0 = arith.constant 0 : index
    %c0_1 = arith.constant 0 : index
    %0 = vector.load %arg3[%c0, %c0_0, %c0_1] : memref<2x16x1xf32, #tpu.memory_space<vmem>>, vector<1x16x1xf32>
    %1 = vector.shape_cast %0 : vector<1x16x1xf32> to vector<16x1xf32>
    %c1 = arith.constant 1 : index
    %c0_2 = arith.constant 0 : index
    %c0_3 = arith.constant 0 : index
    %2 = vector.load %arg3[%c1, %c0_2, %c0_3] : memref<2x16x1xf32, #tpu.memory_space<vmem>>, vector<1x16x1xf32>
    %3 = vector.shape_cast %2 : vector<1x16x1xf32> to vector<16x1xf32>
    %c0_4 = arith.constant 0 : index
    %c0_5 = arith.constant 0 : index
    %c0_6 = arith.constant 0 : index
    %4 = vector.load %arg1[%c0_4, %c0_5, %c0_6] : memref<1x16x128xf32, #tpu.memory_space<vmem>>, vector<1x16x128xf32>
    %5 = vector.shape_cast %1 : vector<16x1xf32> to vector<1x16x1xf32>
    %6 = vector.broadcast %5 : vector<1x16x1xf32> to vector<1x16x128xf32>
    %7 = arith.mulf %4, %6 : vector<1x16x128xf32>
    %8 = vector.shape_cast %3 : vector<16x1xf32> to vector<1x16x1xf32>
    %9 = vector.broadcast %8 : vector<1x16x1xf32> to vector<1x16x128xf32>
    %10 = arith.subf %7, %9 : vector<1x16x128xf32>
    %cst = arith.constant dense<0xFF800000> : vector<1x128xf32>
    %11 = vector.multi_reduction <maximumf>, %10, %cst [1] : vector<1x16x128xf32> to vector<1x128xf32>
    %12 = vector.shape_cast %11 : vector<1x128xf32> to vector<1x1x128xf32>
    %c0_7 = arith.constant 0 : index
    %c0_8 = arith.constant 0 : index
    %c0_9 = arith.constant 0 : index
    %13 = vector.load %arg6[%c0_7, %c0_8, %c0_9] : memref<1x1x128xf32, #tpu.memory_space<vmem>>, vector<1x1x128xf32>
    tpu.vector_store %arg6[%c0_7, %c0_8, %c0_9], %12 {strides = array<i32>} : memref<1x1x128xf32, #tpu.memory_space<vmem>>, vector<1x1x128xf32>,
    %c0_10 = arith.constant 0 : index
    %c0_11 = arith.constant 0 : index
    %c0_12 = arith.constant 0 : index
    %14 = vector.load %arg2[%c0_10, %c0_11, %c0_12] : memref<1x16x16xf32, #tpu.memory_space<vmem>>, vector<1x16x16xf32>
    %c0_13 = arith.constant 0 : index
    %c0_14 = arith.constant 0 : index
    %15 = vector.load %arg4[%c0_13, %c0_14] : memref<128x128xf32, #tpu.memory_space<vmem>>, vector<128x128xf32>
    %c0_15 = arith.constant 0 : index
    %c0_16 = arith.constant 0 : index
    %16 = vector.load %arg5[%c0_15, %c0_16] : memref<1x128xf32, #tpu.memory_space<vmem>>, vector<1x128xf32>
    %17 = vector.shape_cast %14 : vector<1x16x16xf32> to vector<16x16xf32>
    %18 = vector.shape_cast %10 : vector<1x16x128xf32> to vector<16x128xf32>
    %cst_17 = arith.constant dense<0.000000e+00> : vector<16x128xf32>
    %19 = tpu.matmul %17, %18, %cst_17 {dimension_numbers = #tpu.dot_dimension_numbers<[1], [0], [0], [1], [0, 0, 1, 1], [], []>} : vector<16x16xf32>, vector<16x128xf32>, vector<16x128xf32> -> vector<16x128xf32>
    %cst_18 = arith.constant dense<0.000000e+00> : vector<16x128xf32>
    %20 = tpu.matmul %19, %15, %cst_18 {dimension_numbers = #tpu.dot_dimension_numbers<[1], [0], [0], [1], [0, 0, 1, 1], [], []>} : vector<16x128xf32>, vector<128x128xf32>, vector<16x128xf32> -> vector<16x128xf32>
    %21 = vector.shape_cast %20 : vector<16x128xf32> to vector<1x16x128xf32>
    %22 = vector.shape_cast %16 : vector<1x128xf32> to vector<1x1x128xf32>
    %23 = vector.broadcast %22 : vector<1x1x128xf32> to vector<1x16x128xf32>
    %24 = arith.addf %21, %23 : vector<1x16x128xf32>
    %25 = arith.mulf %24, %24 : vector<1x16x128xf32>
    %cst_19 = arith.constant dense<0.000000e+00> : vector<1x16xf32>
    %26 = vector.multi_reduction <add>, %25, %cst_19 [2] : vector<1x16x128xf32> to vector<1x16xf32>
    %27 = vector.shape_cast %26 : vector<1x16xf32> to vector<1x16x1xf32>
    %cst_20 = arith.constant 1.000000e-24 : f32
    %28 = vector.broadcast %cst_20 : f32 to vector<1x16x1xf32>
    %29 = arith.maximumf %27, %28 : vector<1x16x1xf32>
    %30 = math.rsqrt %29 : vector<1x16x1xf32>
    %31 = vector.broadcast %30 : vector<1x16x1xf32> to vector<1x16x128xf32>
    %32 = arith.mulf %24, %31 : vector<1x16x128xf32>
    %cst_21 = arith.constant dense<0xFF800000> : vector<1x128xf32>
    %33 = vector.multi_reduction <maximumf>, %32, %cst_21 [1] : vector<1x16x128xf32> to vector<1x128xf32>
    %34 = vector.shape_cast %33 : vector<1x128xf32> to vector<1x1x128xf32>
    %c0_22 = arith.constant 0 : index
    %c0_23 = arith.constant 0 : index
    %c0_24 = arith.constant 0 : index
    %35 = vector.load %arg7[%c0_22, %c0_23, %c0_24] : memref<1x1x128xf32, #tpu.memory_space<vmem>>, vector<1x1x128xf32>
    tpu.vector_store %arg7[%c0_22, %c0_23, %c0_24], %34 {strides = array<i32>} : memref<1x1x128xf32, #tpu.memory_space<vmem>>, vector<1x1x128xf32>,
    return
  }
  func.func @transform_0(%arg0: i32) -> (i32, i32, i32) {
    %c0_i32 = arith.constant 0 : i32
    %c0_i32_0 = arith.constant 0 : i32
    %c0_i32_1 = arith.constant 0 : i32
    return %arg0, %c0_i32, %c0_i32_0 : i32, i32, i32
  }
  func.func @transform_1(%arg0: i32) -> (i32, i32, i32) {
    %c0_i32 = arith.constant 0 : i32
    %c0_i32_0 = arith.constant 0 : i32
    %c0_i32_1 = arith.constant 0 : i32
    return %arg0, %c0_i32, %c0_i32_0 : i32, i32, i32
  }
  func.func @transform_2(%arg0: i32) -> (i32, i32, i32) {
    %c0_i32 = arith.constant 0 : i32
    %c0_i32_0 = arith.constant 0 : i32
    %c0_i32_1 = arith.constant 0 : i32
    %c0_i32_2 = arith.constant 0 : i32
    return %c0_i32, %c0_i32_0, %c0_i32_1 : i32, i32, i32
  }
  func.func @transform_3(%arg0: i32) -> (i32, i32) {
    %c0_i32 = arith.constant 0 : i32
    %c0_i32_0 = arith.constant 0 : i32
    %c0_i32_1 = arith.constant 0 : i32
    return %c0_i32, %c0_i32_0 : i32, i32
  }
  func.func @transform_4(%arg0: i32) -> (i32, i32) {
    %c0_i32 = arith.constant 0 : i32
    %c0_i32_0 = arith.constant 0 : i32
    %c0_i32_1 = arith.constant 0 : i32
    return %c0_i32, %c0_i32_0 : i32, i32
  }
  func.func @transform_5(%arg0: i32) -> (i32, i32, i32) {
    %c0_i32 = arith.constant 0 : i32
    %c0_i32_0 = arith.constant 0 : i32
    %c0_i32_1 = arith.constant 0 : i32
    return %arg0, %c0_i32, %c0_i32_0 : i32, i32, i32
  }
  func.func @transform_6(%arg0: i32) -> (i32, i32, i32) {
    %c0_i32 = arith.constant 0 : i32
    %c0_i32_0 = arith.constant 0 : i32
    %c0_i32_1 = arith.constant 0 : i32
    return %arg0, %c0_i32, %c0_i32_0 : i32, i32, i32
  }
}

module attributes {stable_mosaic.version = 11 : i64} {
  func.func @_conv_first_kernel(%arg0: i32, %arg1: memref<1x16x128xf32, #tpu.memory_space<vmem>>, %arg2: memref<1x16x16xf32, #tpu.memory_space<vmem>>, %arg3: memref<128x128xf32, #tpu.memory_space<vmem>>, %arg4: memref<1x128xf32, #tpu.memory_space<vmem>>, %arg5: memref<1x16x128xf32, #tpu.memory_space<vmem>>) attributes {dimension_semantics = [#tpu.dimension_semantics<parallel>], iteration_bounds = array<i64: 2>, scalar_prefetch = 0 : i64, scratch_operands = 0 : i64, tpu.core_type = #tpu.core_type<tc>, window_params = [{transform_indices = @transform_0, window_bounds = array<i64: 1, 16, 128>}, {transform_indices = @transform_1, window_bounds = array<i64: 1, 16, 16>}, {pipeline_mode = #tpu.pipeline_mode<synchronous>, transform_indices = @transform_2, window_bounds = array<i64: 128, 128>}, {pipeline_mode = #tpu.pipeline_mode<synchronous>, transform_indices = @transform_3, window_bounds = array<i64: 1, 128>}, {transform_indices = @transform_4, window_bounds = array<i64: 1, 16, 128>}]} {
    %c0 = arith.constant 0 : index
    %c0_0 = arith.constant 0 : index
    %c0_1 = arith.constant 0 : index
    %0 = vector.load %arg2[%c0, %c0_0, %c0_1] : memref<1x16x16xf32, #tpu.memory_space<vmem>>, vector<1x16x16xf32>
    %c0_2 = arith.constant 0 : index
    %c0_3 = arith.constant 0 : index
    %c0_4 = arith.constant 0 : index
    %1 = vector.load %arg1[%c0_2, %c0_3, %c0_4] : memref<1x16x128xf32, #tpu.memory_space<vmem>>, vector<1x16x128xf32>
    %c0_5 = arith.constant 0 : index
    %c0_6 = arith.constant 0 : index
    %2 = vector.load %arg3[%c0_5, %c0_6] : memref<128x128xf32, #tpu.memory_space<vmem>>, vector<128x128xf32>
    %c0_7 = arith.constant 0 : index
    %c0_8 = arith.constant 0 : index
    %3 = vector.load %arg4[%c0_7, %c0_8] : memref<1x128xf32, #tpu.memory_space<vmem>>, vector<1x128xf32>
    %4 = vector.shape_cast %0 : vector<1x16x16xf32> to vector<16x16xf32>
    %5 = vector.shape_cast %1 : vector<1x16x128xf32> to vector<16x128xf32>
    %cst = arith.constant dense<0.000000e+00> : vector<16x128xf32>
    %6 = tpu.matmul %4, %5, %cst {dimension_numbers = #tpu.dot_dimension_numbers<[1], [0], [0], [1], [0, 0, 1, 1], [], []>} : vector<16x16xf32>, vector<16x128xf32>, vector<16x128xf32> -> vector<16x128xf32>
    %cst_9 = arith.constant dense<0.000000e+00> : vector<16x128xf32>
    %7 = tpu.matmul %6, %2, %cst_9 {dimension_numbers = #tpu.dot_dimension_numbers<[1], [0], [0], [1], [0, 0, 1, 1], [], []>} : vector<16x128xf32>, vector<128x128xf32>, vector<16x128xf32> -> vector<16x128xf32>
    %8 = vector.shape_cast %7 : vector<16x128xf32> to vector<1x16x128xf32>
    %9 = vector.shape_cast %3 : vector<1x128xf32> to vector<1x1x128xf32>
    %10 = vector.broadcast %9 : vector<1x1x128xf32> to vector<1x16x128xf32>
    %11 = arith.addf %8, %10 : vector<1x16x128xf32>
    %12 = arith.mulf %11, %11 : vector<1x16x128xf32>
    %cst_10 = arith.constant dense<0.000000e+00> : vector<1x16xf32>
    %13 = vector.multi_reduction <add>, %12, %cst_10 [2] : vector<1x16x128xf32> to vector<1x16xf32>
    %14 = vector.shape_cast %13 : vector<1x16xf32> to vector<1x16x1xf32>
    %cst_11 = arith.constant 1.000000e-24 : f32
    %15 = vector.broadcast %cst_11 : f32 to vector<1x16x1xf32>
    %16 = arith.maximumf %14, %15 : vector<1x16x1xf32>
    %17 = math.rsqrt %16 : vector<1x16x1xf32>
    %18 = vector.broadcast %17 : vector<1x16x1xf32> to vector<1x16x128xf32>
    %19 = arith.mulf %11, %18 : vector<1x16x128xf32>
    %cst_12 = arith.constant 0.000000e+00 : f32
    %20 = vector.broadcast %cst_12 : f32 to vector<1x16x128xf32>
    %21 = arith.maximumf %19, %20 : vector<1x16x128xf32>
    %c0_13 = arith.constant 0 : index
    %c0_14 = arith.constant 0 : index
    %c0_15 = arith.constant 0 : index
    %22 = vector.load %arg5[%c0_13, %c0_14, %c0_15] : memref<1x16x128xf32, #tpu.memory_space<vmem>>, vector<1x16x128xf32>
    tpu.vector_store %arg5[%c0_13, %c0_14, %c0_15], %21 {strides = array<i32>} : memref<1x16x128xf32, #tpu.memory_space<vmem>>, vector<1x16x128xf32>,
    return
  }
  func.func @transform_0(%arg0: i32) -> (i32, i32, i32) {
    %c0_i32 = arith.constant 0 : i32
    %c0_i32_0 = arith.constant 0 : i32
    %c0_i32_1 = arith.constant 0 : i32
    return %arg0, %c0_i32, %c0_i32_0 : i32, i32, i32
  }
  func.func @transform_1(%arg0: i32) -> (i32, i32, i32) {
    %c0_i32 = arith.constant 0 : i32
    %c0_i32_0 = arith.constant 0 : i32
    %c0_i32_1 = arith.constant 0 : i32
    return %arg0, %c0_i32, %c0_i32_0 : i32, i32, i32
  }
  func.func @transform_2(%arg0: i32) -> (i32, i32) {
    %c0_i32 = arith.constant 0 : i32
    %c0_i32_0 = arith.constant 0 : i32
    %c0_i32_1 = arith.constant 0 : i32
    return %c0_i32, %c0_i32_0 : i32, i32
  }
  func.func @transform_3(%arg0: i32) -> (i32, i32) {
    %c0_i32 = arith.constant 0 : i32
    %c0_i32_0 = arith.constant 0 : i32
    %c0_i32_1 = arith.constant 0 : i32
    return %c0_i32, %c0_i32_0 : i32, i32
  }
  func.func @transform_4(%arg0: i32) -> (i32, i32, i32) {
    %c0_i32 = arith.constant 0 : i32
    %c0_i32_0 = arith.constant 0 : i32
    %c0_i32_1 = arith.constant 0 : i32
    return %arg0, %c0_i32, %c0_i32_0 : i32, i32, i32
  }
}

</mosaic_0001>

<bundles_post_ra>
// kernel: gcn_encoder_forward.5
= control target key start
LH: loop header
LB: loop body
LE: loop exit
PB: predicated region body
PF: predicated region fallthrough
CT: control target
= control target key end

     0   :  { %s745_s21 = smov 0   ;;  %s846_s0 = inlined_call_operand.vmem [shape: f32[2,16,128], index: 0, kind: input, shape index: {}]   ;;  %s847_s1 = inlined_call_operand.vmem [shape: f32[2,16,16], index: 1, kind: input, shape index: {}]   ;;  %s848_s2 = inlined_call_operand.vmem [shape: f32[2,16,1], index: 2, kind: input, shape index: {}]   ;;  %s849_s3 = inlined_call_operand.vmem [shape: f32[128,128], index: 3, kind: input, shape index: {}]   ;;  %s850_s4 = inlined_call_operand.vmem [shape: f32[1,128], index: 4, kind: input, shape index: {}]   ;;  %s851_s5 = inlined_call_operand.vmem [shape: f32[2,1,128], index: 5, kind: output, shape index: {0}]   ;;  %s852_s6 = inlined_call_operand.vmem [shape: f32[2,1,128], index: 6, kind: output, shape index: {1}]  }
   0x1 LB: > { %s604_s22 = sadd.s32 4294967295, %s707_s21   ;;  %p608_p0 = scmp.ge.s32.totalorder %s707_s21, 1  ;;  %s707_s21 = sphi %s745_s21, %s17_s21  }
   0x2   : > { %p225_p1 = scmp.lt.s32.totalorder %s707_s21, 3 }
   0x4   : > { %p226_p2 = pnand %p608_p0, %p225_p1 }
   0x5   : > { %p261_p3 = scmp.lt.s32.totalorder (!%p226_p2), %s604_s22, 1 }
   0x6   : > { %229 = sbr.rel (%p226_p2) target bundleno = 713 (0x2c9), region = 40 }
   0xb   : > { %v614_v0 = vld [vmem:[%s848_s2 + $0x18] sm:$0xff]  ;;  %v278_v1 = vld [vmem:[%s848_s2 + $0x8] sm:$0xff]  ;;  %v709_v2 = vmov 0   ;;  %s854_s22 = smov (!%p261_p3, %s604_s22), 1  ;;  %v613_v3 = vld [vmem:[%s848_s2 + $0x10] sm:$0xff]  ;;  %vm335_vm0 = vcmask 130048  }
   0xc   : > { %696 = vset.pattern.permute.xlu1 %v709_v2  ;;  %695 = vset.pattern.permute.xlu0 %v709_v2  ;;  %v277_v4 = vld [vmem:[%s848_s2] sm:$0xff]  ;;  %s620_s7 = sshll.u32 %s854_s22, 4  ;;  %v333_v6 = vld [vmem:[%s849_s3 + $0x78] sm:$0xff]  ;;  %v332_v7 = vld [vmem:[%s849_s3 + $0x70] sm:$0xff]  ;;  %s273_s25 = scalar_lea.vmem %s851_s5, %s854_s22 }
   0xd   : > { %303 = vperm.xlu1 %696, %v614_v0   ;;  %291 = vperm.xlu0 %695, %v278_v1   ;;  %s773_s10 = scalar_lea.vmem %s847_s1, %s620_s7  ;;  %v331_v8 = vld [vmem:[%s849_s3 + $0x68] sm:$0xff]  ;;  %v330_v9 = vld [vmem:[%s849_s3 + $0x60] sm:$0xff]  ;;  %v329_v10 = vld [vmem:[%s849_s3 + $0x58] sm:$0xff]  ;;  %s265_s23 = scalar_lea.vmem %s846_s0, %s620_s7 }
   0xe   : > { %v316_v5 = vld [vmem:[%s773_s10] sm:$0xff]  ;;  %651 = vmatprep.subr.mxu1 %v333_v6  ;;  %v328_v11 = vld [vmem:[%s849_s3 + $0x50] sm:$0xff]  ;;  %v327_v12 = vld [vmem:[%s849_s3 + $0x48] sm:$0xff]  ;;  %s276_s11 = scalar_lea.vmem %s852_s6, %s854_s22 }
   0xf   : > { %648 = vmatprep.mubr.msk.f32.mxu0 %vm335_vm0, %v316_v5  ;;  %652 = vmatpush3.msra.mxu1 %v333_v6  ;;  %v326_v13 = vld [vmem:[%s849_s3 + $0x40] sm:$0xff]  ;;  %v325_v14 = vld [vmem:[%s849_s3 + $0x38] sm:$0xff]  ;;  %v324_v15 = vld [vmem:[%s849_s3 + $0x30] sm:$0xff] }
  0x10   : > { %653 = vmatprep.subr.mxu1 %v332_v7  ;;  %v323_v16 = vld [vmem:[%s849_s3 + $0x28] sm:$0xff]  ;;  %v322_v17 = vld [vmem:[%s849_s3 + $0x20] sm:$0xff]  ;;  %v321_v18 = vld [vmem:[%s849_s3 + $0x18] sm:$0xff] }
  0x11   : > { %298 = vperm.xlu1 %696, %v613_v3   ;;  %286 = vperm.xlu0 %695, %v277_v4   ;;  %v320_v19 = vld [vmem:[%s849_s3 + $0x10] sm:$0xff]  ;;  %v283_v20 = vld [vmem:[%s265_s23 + $0x8] sm:$0xff]  ;;  %v282_v24 = vld [vmem:[%s265_s23] sm:$0xff] }
  0x12   : > { %654 = vmatpush3.msra.mxu1 %v332_v7  ;;  %v317_v30 = vld [vmem:[%s773_s10 + $0x8] sm:$0xff]  ;;  %v318_v39 = vld [vmem:[%s849_s3] sm:$0xff] }
  0x13   : > { %655 = vmatprep.subr.mxu1 %v331_v8  ;;  %v319_v38 = vld [vmem:[%s849_s3 + $0x8] sm:$0xff]  ;;  %v617_v42 = vld [vmem:[%s850_s4] ss:$0 sm:$0xff] }
  0x14   : > { %656 = vmatpush3.msra.mxu1 %v331_v8 }
  0x15   : > { %657 = vmatprep.subr.mxu1 %v330_v9 }
  0x16   : > { %658 = vmatpush3.msra.mxu1 %v330_v9 }
  0x17   : > { %659 = vmatprep.subr.mxu1 %v329_v10 }
  0x18   : > { %660 = vmatpush3.msra.mxu1 %v329_v10 }
  0x19   : > { %661 = vmatprep.subr.mxu1 %v328_v11 }
  0x1a   : > { %662 = vmatpush3.msra.mxu1 %v328_v11 }
  0x1b   : > { %663 = vmatprep.subr.mxu1 %v327_v12 }
  0x1c   : > { %664 = vmatpush3.msra.mxu1 %v327_v12 }
  0x1d   : > { %665 = vmatprep.subr.mxu1 %v326_v13 }
  0x1e   : > { %666 = vmatpush3.msra.mxu1 %v326_v13 }
  0x1f   : > { %667 = vmatprep.subr.mxu1 %v325_v14 }
  0x20   : > { %668 = vmatpush3.msra.mxu1 %v325_v14 }
  0x21   : > { %669 = vmatprep.subr.mxu1 %v324_v15 }
  0x22   : > { %670 = vmatpush3.msra.mxu1 %v324_v15 }
  0x23   : > { %671 = vmatprep.subr.mxu1 %v323_v16 }
  0x24   : > { %672 = vmatpush3.msra.mxu1 %v323_v16 }
  0x25   : > { %673 = vmatprep.subr.mxu1 %v322_v17 }
  0x26   : > { %674 = vmatpush3.msra.mxu1 %v322_v17 }
  0x27   : > { %675 = vmatprep.subr.mxu1 %v321_v18 }
  0x28   : > { %676 = vmatpush3.msra.mxu1 %v321_v18 }
  0x29   : > { %677 = vmatprep.subr.mxu1 %v320_v19 }
  0x2a   : > { %678 = vmatpush3.msra.mxu1 %v320_v19 }
  0x2b   : > { %679 = vmatprep.subr.mxu1 %v319_v38 }
  0x2c   : > { %680 = vmatpush3.msra.mxu1 %v319_v38 }
  0x2d   : > { %681 = vmatprep.subr.mxu1 %v318_v39 }
  0x2e   : > { %682 = vmatpush3.msra.mxu1 %v318_v39 }
  0x88   : > { %v304_v21 = vpop.permute.xlu1 %303  ;;  %v292_v22 = vpop.permute.xlu0 %291 }
  0x89   : > { %v295_v23 = vmul.f32 %v292_v22, %v283_v20 }
  0x8b   : > { %v307_v25 = vsub.f32 %v295_v23, %v304_v21 }
  0x8c   : > { %v287_v26 = vpop.permute.xlu0 %286  ;;  %v299_v28 = vpop.permute.xlu1 %298 }
  0x8d   : > { %v294_v27 = vmul.f32 %v287_v26, %v282_v24  ;;  %644 = vmatprep.subr.mxu0 %v307_v25 }
  0x8e   : > { %645 = vmatpush3.msra.mxu0 %v307_v25 }
  0x8f   : > { %v306_v29 = vsub.f32 %v294_v27, %v299_v28 }
  0x91   : > { %v308_v31 = vmax.f32 %v306_v29, %v307_v25  ;;  %646 = vmatprep.subr.mxu0 %v306_v29 }
  0x92   : > { %647 = vmatpush3.msra.mxu0 %v306_v29 }
  0x93   : > { %v309_v32 = vrot.slane %v308_v31, 4  ;;  %649 = vmatmul.mubr.msk.f32.vlgmr.msra.gmra.mxu0 %vm335_vm0, %v317_v30 }
  0x95   : > { %v310_v33 = vmax.f32 %v308_v31, %v309_v32 }
  0x97   : > { %v311_v34 = vrot.slane %v310_v33, 2 }
  0x99   : > { %v312_v35 = vmax.f32 %v310_v33, %v311_v34 }
  0x9b   : > { %v313_v36 = vrot.slane %v312_v35, 1 }
  0x9d   : > { %v314_v37 = vmax.f32 %v312_v35, %v313_v36 }
  0x9f   : > { %315 = vst [vmem:[%s273_s25] sm:$0x1] %v314_v37 }
 0x153   : > { %v650_v40 = vpop.f32.mrf.mxu0 }
 0x155   : > { %v408_v41 = vpop.f32.mrf.mxu0 }
 0x156   : > { %683 = vmatprep.mubr.f32.mxu1 %v408_v41 }
 0x157   : > { %684 = vmatmul.mubr.f32.vlgmr.msra.gmra.mxu1 %v650_v40 }
 0x217   : > { %v685_v43 = vpop.f32.mrf.mxu1 }
 0x218   : > { %v499_v44 = vadd.f32 %v685_v43, %v617_v42 }
 0x219   : > { %v483_v45 = vpop.f32.mrf.mxu1 }
 0x21a   : > { %v498_v46 = vadd.f32 %v617_v42, %v483_v45  ;;  %v501_v47 = vmul.f32 %v499_v44, %v499_v44 }
 0x21c   : > { %504 = vadd.xlane.f32.xlu1 %v501_v47  ;;  %v500_v48 = vmul.f32 %v498_v46, %v498_v46 }
 0x21e   : > { %502 = vadd.xlane.f32.xlu0 %v500_v48 }
 0x2a5   : > { %v505_v49 = vpop.xlane.xlu1 %504 }
 0x2a6   : > { %v507_v50 = vmax.f32 %v505_v49, 1e-24 }
 0x2a7   : > { %v503_v51 = vpop.xlane.xlu0 %502 }
 0x2a8   : > { %697 = vrsqrt.f32 %v507_v50  ;;  %v506_v52 = vmax.f32 %v503_v51, 1e-24 }
 0x2aa   : > { %699 = vrsqrt.f32 %v506_v52 }
 0x2b5   : > { %v698_v53 = vpop.eup %697 }
 0x2b6   : > { %v511_v55 = vmul.f32 %v698_v53, %v499_v44 }
 0x2b7   : > { %v700_v54 = vpop.eup %699 }
 0x2b8   : > { %v510_v56 = vmul.f32 %v700_v54, %v498_v46 }
 0x2ba   : > { %v512_v57 = vmax.f32 %v510_v56, %v511_v55 }
 0x2bc   : > { %v513_v58 = vrot.slane %v512_v57, 4 }
 0x2be   : > { %v514_v59 = vmax.f32 %v512_v57, %v513_v58 }
 0x2c0   : > { %v515_v60 = vrot.slane %v514_v59, 2 }
 0x2c2   : > { %v516_v61 = vmax.f32 %v514_v59, %v515_v60 }
 0x2c4   : > { %v517_v62 = vrot.slane %v516_v61, 1 }
 0x2c6   : > { %v518_v63 = vmax.f32 %v516_v61, %v517_v62 }
 0x2c8   : > { %519 = vst [vmem:[%s276_s11] sm:$0x1] %v518_v63 }
 0x2c9 PF: > { %s17_s21 = sadd.s32 1, %s707_s21  }
 0x2ca   : > { %p14_p4 = scmp.ge.s32.totalorder %s17_s21, 4  }
 0x2cc   :  { %16 = sbr.rel (!%p14_p4) target bundleno = 1 (0x1), region = 86 }

// kernel: gcn_encoder_forward.4
= control target key start
LH: loop header
LB: loop body
LE: loop exit
PB: predicated region body
PF: predicated region fallthrough
CT: control target
= control target key end

     0   :  { %s756_s21 = smov 0   ;;  %s857_s0 = inlined_call_operand.vmem [shape: f32[2,16,128], index: 0, kind: input, shape index: {}]   ;;  %s858_s1 = inlined_call_operand.vmem [shape: f32[2,16,16], index: 1, kind: input, shape index: {}]   ;;  %s859_s2 = inlined_call_operand.vmem [shape: f32[2,16,1], index: 2, kind: input, shape index: {}]   ;;  %s860_s3 = inlined_call_operand.vmem [shape: f32[128,128], index: 3, kind: input, shape index: {}]   ;;  %s861_s4 = inlined_call_operand.vmem [shape: f32[1,128], index: 4, kind: input, shape index: {}]   ;;  %s862_s5 = inlined_call_operand.vmem [shape: f32[2,16,128], index: 5, kind: output, shape index: {0}]   ;;  %s863_s6 = inlined_call_operand.vmem [shape: f32[2,1,128], index: 6, kind: output, shape index: {1}]  }
   0x1 LB: > { %s612_s22 = sadd.s32 4294967295, %s718_s21   ;;  %p616_p0 = scmp.ge.s32.totalorder %s718_s21, 1  ;;  %s718_s21 = sphi %s756_s21, %s17_s21  }
   0x2   : > { %p225_p1 = scmp.lt.s32.totalorder %s718_s21, 3 }
   0x4   : > { %p226_p2 = pnand %p616_p0, %p225_p1 }
   0x5   : > { %p263_p3 = scmp.lt.s32.totalorder (!%p226_p2), %s612_s22, 1 }
   0x6   : > { %229 = sbr.rel (%p226_p2) target bundleno = 701 (0x2bd), region = 40 }
   0xb   : > { %v624_v0 = vld [vmem:[%s859_s2 + $0x18] sm:$0xff]  ;;  %v282_v1 = vld [vmem:[%s859_s2 + $0x8] sm:$0xff]  ;;  %v720_v2 = vmov 0   ;;  %s865_s22 = smov (!%p263_p3, %s612_s22), 1  ;;  %v623_v3 = vld [vmem:[%s859_s2 + $0x10] sm:$0xff]  ;;  %vm339_vm0 = vcmask 130048  }
   0xc   : > { %707 = vset.pattern.permute.xlu1 %v720_v2  ;;  %706 = vset.pattern.permute.xlu0 %v720_v2  ;;  %v281_v4 = vld [vmem:[%s859_s2] sm:$0xff]  ;;  %s779_s7 = sshll.u32 %s865_s22, 4  ;;  %v337_v6 = vld [vmem:[%s860_s3 + $0x78] sm:$0xff]  ;;  %v336_v7 = vld [vmem:[%s860_s3 + $0x70] sm:$0xff]  ;;  %s280_s26 = scalar_lea.vmem %s863_s6, %s865_s22 }
   0xd   : > { %307 = vperm.xlu1 %707, %v624_v0   ;;  %295 = vperm.xlu0 %706, %v282_v1   ;;  %s785_s10 = scalar_lea.vmem %s858_s1, %s779_s7  ;;  %v335_v8 = vld [vmem:[%s860_s3 + $0x68] sm:$0xff]  ;;  %v334_v9 = vld [vmem:[%s860_s3 + $0x60] sm:$0xff]  ;;  %v333_v10 = vld [vmem:[%s860_s3 + $0x58] sm:$0xff]  ;;  %s267_s23 = scalar_lea.vmem %s857_s0, %s779_s7 }
   0xe   : > { %v320_v5 = vld [vmem:[%s785_s10] sm:$0xff]  ;;  %662 = vmatprep.subr.mxu1 %v337_v6  ;;  %v332_v11 = vld [vmem:[%s860_s3 + $0x50] sm:$0xff]  ;;  %v331_v12 = vld [vmem:[%s860_s3 + $0x48] sm:$0xff]  ;;  %s277_s11 = scalar_lea.vmem %s862_s5, %s779_s7 }
   0xf   : > { %659 = vmatprep.mubr.msk.f32.mxu0 %vm339_vm0, %v320_v5  ;;  %663 = vmatpush3.msra.mxu1 %v337_v6  ;;  %v330_v13 = vld [vmem:[%s860_s3 + $0x40] sm:$0xff]  ;;  %v329_v14 = vld [vmem:[%s860_s3 + $0x38] sm:$0xff]  ;;  %v328_v15 = vld [vmem:[%s860_s3 + $0x30] sm:$0xff] }
  0x10   : > { %664 = vmatprep.subr.mxu1 %v336_v7  ;;  %v327_v16 = vld [vmem:[%s860_s3 + $0x28] sm:$0xff]  ;;  %v326_v17 = vld [vmem:[%s860_s3 + $0x20] sm:$0xff]  ;;  %v325_v18 = vld [vmem:[%s860_s3 + $0x18] sm:$0xff] }
  0x11   : > { %302 = vperm.xlu1 %707, %v623_v3   ;;  %290 = vperm.xlu0 %706, %v281_v4   ;;  %v324_v19 = vld [vmem:[%s860_s3 + $0x10] sm:$0xff]  ;;  %v287_v20 = vld [vmem:[%s267_s23 + $0x8] sm:$0xff]  ;;  %v286_v24 = vld [vmem:[%s267_s23] sm:$0xff] }
  0x12   : > { %665 = vmatpush3.msra.mxu1 %v336_v7  ;;  %v321_v30 = vld [vmem:[%s785_s10 + $0x8] sm:$0xff]  ;;  %v322_v39 = vld [vmem:[%s860_s3] sm:$0xff] }
  0x13   : > { %666 = vmatprep.subr.mxu1 %v335_v8  ;;  %v323_v38 = vld [vmem:[%s860_s3 + $0x8] sm:$0xff]  ;;  %v627_v42 = vld [vmem:[%s861_s4] ss:$0 sm:$0xff] }
  0x14   : > { %667 = vmatpush3.msra.mxu1 %v335_v8 }
  0x15   : > { %668 = vmatprep.subr.mxu1 %v334_v9 }
  0x16   : > { %669 = vmatpush3.msra.mxu1 %v334_v9 }
  0x17   : > { %670 = vmatprep.subr.mxu1 %v333_v10 }
  0x18   : > { %671 = vmatpush3.msra.mxu1 %v333_v10 }
  0x19   : > { %672 = vmatprep.subr.mxu1 %v332_v11 }
  0x1a   : > { %673 = vmatpush3.msra.mxu1 %v332_v11 }
  0x1b   : > { %674 = vmatprep.subr.mxu1 %v331_v12 }
  0x1c   : > { %675 = vmatpush3.msra.mxu1 %v331_v12 }
  0x1d   : > { %676 = vmatprep.subr.mxu1 %v330_v13 }
  0x1e   : > { %677 = vmatpush3.msra.mxu1 %v330_v13 }
  0x1f   : > { %678 = vmatprep.subr.mxu1 %v329_v14 }
  0x20   : > { %679 = vmatpush3.msra.mxu1 %v329_v14 }
  0x21   : > { %680 = vmatprep.subr.mxu1 %v328_v15 }
  0x22   : > { %681 = vmatpush3.msra.mxu1 %v328_v15 }
  0x23   : > { %682 = vmatprep.subr.mxu1 %v327_v16 }
  0x24   : > { %683 = vmatpush3.msra.mxu1 %v327_v16 }
  0x25   : > { %684 = vmatprep.subr.mxu1 %v326_v17 }
  0x26   : > { %685 = vmatpush3.msra.mxu1 %v326_v17 }
  0x27   : > { %686 = vmatprep.subr.mxu1 %v325_v18 }
  0x28   : > { %687 = vmatpush3.msra.mxu1 %v325_v18 }
  0x29   : > { %688 = vmatprep.subr.mxu1 %v324_v19 }
  0x2a   : > { %689 = vmatpush3.msra.mxu1 %v324_v19 }
  0x2b   : > { %690 = vmatprep.subr.mxu1 %v323_v38 }
  0x2c   : > { %691 = vmatpush3.msra.mxu1 %v323_v38 }
  0x2d   : > { %692 = vmatprep.subr.mxu1 %v322_v39 }
  0x2e   : > { %693 = vmatpush3.msra.mxu1 %v322_v39 }
  0x88   : > { %v308_v21 = vpop.permute.xlu1 %307  ;;  %v296_v22 = vpop.permute.xlu0 %295 }
  0x89   : > { %v299_v23 = vmul.f32 %v296_v22, %v287_v20 }
  0x8b   : > { %v311_v25 = vsub.f32 %v299_v23, %v308_v21 }
  0x8c   : > { %v291_v26 = vpop.permute.xlu0 %290  ;;  %v303_v28 = vpop.permute.xlu1 %302 }
  0x8d   : > { %v298_v27 = vmul.f32 %v291_v26, %v286_v24  ;;  %655 = vmatprep.subr.mxu0 %v311_v25 }
  0x8e   : > { %656 = vmatpush3.msra.mxu0 %v311_v25 }
  0x8f   : > { %v310_v29 = vsub.f32 %v298_v27, %v303_v28 }
  0x91   : > { %v312_v31 = vmax.f32 %v310_v29, %v311_v25  ;;  %657 = vmatprep.subr.mxu0 %v310_v29 }
  0x92   : > { %658 = vmatpush3.msra.mxu0 %v310_v29 }
  0x93   : > { %v313_v32 = vrot.slane %v312_v31, 4  ;;  %660 = vmatmul.mubr.msk.f32.vlgmr.msra.gmra.mxu0 %vm339_vm0, %v321_v30 }
  0x95   : > { %v314_v33 = vmax.f32 %v312_v31, %v313_v32 }
  0x97   : > { %v315_v34 = vrot.slane %v314_v33, 2 }
  0x99   : > { %v316_v35 = vmax.f32 %v314_v33, %v315_v34 }
  0x9b   : > { %v317_v36 = vrot.slane %v316_v35, 1 }
  0x9d   : > { %v318_v37 = vmax.f32 %v316_v35, %v317_v36 }
  0x9f   : > { %319 = vst [vmem:[%s280_s26] sm:$0x1] %v318_v37 }
 0x153   : > { %v661_v40 = vpop.f32.mrf.mxu0 }
 0x155   : > { %v412_v41 = vpop.f32.mrf.mxu0 }
 0x156   : > { %694 = vmatprep.mubr.f32.mxu1 %v412_v41 }
 0x157   : > { %695 = vmatmul.mubr.f32.vlgmr.msra.gmra.mxu1 %v661_v40 }
 0x217   : > { %v696_v43 = vpop.f32.mrf.mxu1 }
 0x218   : > { %v503_v44 = vadd.f32 %v696_v43, %v627_v42 }
 0x219   : > { %v487_v45 = vpop.f32.mrf.mxu1 }
 0x21a   : > { %v502_v46 = vadd.f32 %v627_v42, %v487_v45  ;;  %v505_v47 = vmul.f32 %v503_v44, %v503_v44 }
 0x21c   : > { %508 = vadd.xlane.f32.xlu1 %v505_v47  ;;  %v504_v48 = vmul.f32 %v502_v46, %v502_v46 }
 0x21e   : > { %506 = vadd.xlane.f32.xlu0 %v504_v48 }
 0x2a5   : > { %v509_v49 = vpop.xlane.xlu1 %508 }
 0x2a6   : > { %v511_v50 = vmax.f32 %v509_v49, 1e-24 }
 0x2a7   : > { %v507_v51 = vpop.xlane.xlu0 %506 }
 0x2a8   : > { %708 = vrsqrt.f32 %v511_v50  ;;  %v510_v52 = vmax.f32 %v507_v51, 1e-24 }
 0x2aa   : > { %710 = vrsqrt.f32 %v510_v52 }
 0x2b5   : > { %v709_v53 = vpop.eup %708 }
 0x2b6   : > { %v515_v54 = vmul.f32 %v709_v53, %v503_v44 }
 0x2b7   : > { %v711_v55 = vpop.eup %710 }
 0x2b8   : > { %v517_v56 = vmax.f32 %v515_v54, 0.0  ;;  %v514_v57 = vmul.f32 %v711_v55, %v502_v46 }
 0x2ba   : > { %519 = vst [vmem:[%s277_s11 + $0x8] sm:$0xff] %v517_v56  ;;  %v516_v58 = vmax.f32 %v514_v57, 0.0 }
 0x2bc   : > { %518 = vst [vmem:[%s277_s11] sm:$0xff] %v516_v58 }
 0x2bd PF: > { %s17_s21 = sadd.s32 1, %s718_s21  }
 0x2be   : > { %p14_p4 = scmp.ge.s32.totalorder %s17_s21, 4  }
 0x2c0   :  { %16 = sbr.rel (!%p14_p4) target bundleno = 1 (0x1), region = 86 }

// kernel: gcn_encoder_forward.3
= control target key start
LH: loop header
LB: loop body
LE: loop exit
PB: predicated region body
PF: predicated region fallthrough
CT: control target
= control target key end

     0   :  { %s615_s15 = smov 0   ;;  %s693_s0 = inlined_call_operand.vmem [shape: f32[2,16,128], index: 0, kind: input, shape index: {}]   ;;  %s694_s1 = inlined_call_operand.vmem [shape: f32[2,16,16], index: 1, kind: input, shape index: {}]   ;;  %s695_s2 = inlined_call_operand.vmem [shape: f32[128,128], index: 2, kind: input, shape index: {}]   ;;  %s696_s3 = inlined_call_operand.vmem [shape: f32[1,128], index: 3, kind: input, shape index: {}]   ;;  %s697_s4 = inlined_call_operand.vmem [shape: f32[2,16,128], index: 4, kind: output, shape index: {}]  }
   0x1 LB: > { %s487_s16 = sadd.s32 4294967295, %s588_s15   ;;  %p491_p0 = scmp.ge.s32.totalorder %s588_s15, 1  ;;  %s588_s15 = sphi %s615_s15, %s14_s15  }
   0x2   : > { %p172_p1 = scmp.lt.s32.totalorder %s588_s15, 3 }
   0x4   : > { %p173_p2 = pnand %p491_p0, %p172_p1 }
   0x5   : > { %p203_p3 = scmp.lt.s32.totalorder (!%p173_p2), %s487_s16, 1 }
   0x6   : > { %176 = sbr.rel (%p173_p2) target bundleno = 578 (0x242), region = 36 }
   0xb   : > { %v237_v0 = vld [vmem:[%s695_s2 + $0x78] sm:$0xff]  ;;  %v236_v1 = vld [vmem:[%s695_s2 + $0x70] sm:$0xff]  ;;  %s699_s16 = smov (!%p203_p3, %s487_s16), 1  ;;  %v235_v2 = vld [vmem:[%s695_s2 + $0x68] sm:$0xff]  ;;  %vm239_vm0 = vcmask 130048  }
   0xc   : > { %535 = vmatprep.subr.mxu1 %v237_v0  ;;  %s632_s23 = sshll.u32 %s699_s16, 4  ;;  %v234_v3 = vld [vmem:[%s695_s2 + $0x60] sm:$0xff]  ;;  %v233_v7 = vld [vmem:[%s695_s2 + $0x58] sm:$0xff]  ;;  %v232_v9 = vld [vmem:[%s695_s2 + $0x50] sm:$0xff] }
   0xd   : > { %536 = vmatpush3.msra.mxu1 %v237_v0  ;;  %s207_s28 = scalar_lea.vmem %s693_s0, %s632_s23  ;;  %s212_s5 = scalar_lea.vmem %s694_s1, %s632_s23  ;;  %v231_v10 = vld [vmem:[%s695_s2 + $0x48] sm:$0xff]  ;;  %v230_v11 = vld [vmem:[%s695_s2 + $0x40] sm:$0xff]  ;;  %v229_v12 = vld [vmem:[%s695_s2 + $0x38] sm:$0xff] }
   0xe   : > { %537 = vmatprep.subr.mxu1 %v236_v1  ;;  %v221_v4 = vld [vmem:[%s207_s28 + $0x8] sm:$0xff]  ;;  %v220_v5 = vld [vmem:[%s207_s28] sm:$0xff]  ;;  %v228_v13 = vld [vmem:[%s695_s2 + $0x30] sm:$0xff]  ;;  %s217_s10 = scalar_lea.vmem %s697_s4, %s632_s23 }
   0xf   : > { %538 = vmatpush3.msra.mxu1 %v236_v1  ;;  %528 = vmatprep.subr.mxu0 %v221_v4  ;;  %v218_v6 = vld [vmem:[%s212_s5] sm:$0xff]  ;;  %v219_v8 = vld [vmem:[%s212_s5 + $0x8] sm:$0xff]  ;;  %v225_v16 = vld [vmem:[%s695_s2 + $0x18] sm:$0xff] }
  0x10   : > { %539 = vmatprep.subr.mxu1 %v235_v2  ;;  %529 = vmatpush3.msra.mxu0 %v221_v4  ;;  %v227_v14 = vld [vmem:[%s695_s2 + $0x28] sm:$0xff]  ;;  %v226_v15 = vld [vmem:[%s695_s2 + $0x20] sm:$0xff]  ;;  %v224_v17 = vld [vmem:[%s695_s2 + $0x10] sm:$0xff] }
  0x11   : > { %540 = vmatpush3.msra.mxu1 %v235_v2  ;;  %532 = vmatprep.mubr.msk.f32.mxu0 %vm239_vm0, %v218_v6  ;;  %v223_v18 = vld [vmem:[%s695_s2 + $0x8] sm:$0xff]  ;;  %v222_v19 = vld [vmem:[%s695_s2] sm:$0xff] }
  0x12   : > { %541 = vmatprep.subr.mxu1 %v234_v3  ;;  %530 = vmatprep.subr.mxu0 %v220_v5  ;;  %v500_v23 = vld [vmem:[%s696_s3] ss:$0 sm:$0xff] }
  0x13   : > { %542 = vmatpush3.msra.mxu1 %v234_v3  ;;  %531 = vmatpush3.msra.mxu0 %v220_v5 }
  0x14   : > { %543 = vmatprep.subr.mxu1 %v233_v7  ;;  %533 = vmatmul.mubr.msk.f32.vlgmr.msra.gmra.mxu0 %vm239_vm0, %v219_v8 }
  0x15   : > { %544 = vmatpush3.msra.mxu1 %v233_v7 }
  0x16   : > { %545 = vmatprep.subr.mxu1 %v232_v9 }
  0x17   : > { %546 = vmatpush3.msra.mxu1 %v232_v9 }
  0x18   : > { %547 = vmatprep.subr.mxu1 %v231_v10 }
  0x19   : > { %548 = vmatpush3.msra.mxu1 %v231_v10 }
  0x1a   : > { %549 = vmatprep.subr.mxu1 %v230_v11 }
  0x1b   : > { %550 = vmatpush3.msra.mxu1 %v230_v11 }
  0x1c   : > { %551 = vmatprep.subr.mxu1 %v229_v12 }
  0x1d   : > { %552 = vmatpush3.msra.mxu1 %v229_v12 }
  0x1e   : > { %553 = vmatprep.subr.mxu1 %v228_v13 }
  0x1f   : > { %554 = vmatpush3.msra.mxu1 %v228_v13 }
  0x20   : > { %555 = vmatprep.subr.mxu1 %v227_v14 }
  0x21   : > { %556 = vmatpush3.msra.mxu1 %v227_v14 }
  0x22   : > { %557 = vmatprep.subr.mxu1 %v226_v15 }
  0x23   : > { %558 = vmatpush3.msra.mxu1 %v226_v15 }
  0x24   : > { %559 = vmatprep.subr.mxu1 %v225_v16 }
  0x25   : > { %560 = vmatpush3.msra.mxu1 %v225_v16 }
  0x26   : > { %561 = vmatprep.subr.mxu1 %v224_v17 }
  0x27   : > { %562 = vmatpush3.msra.mxu1 %v224_v17 }
  0x28   : > { %563 = vmatprep.subr.mxu1 %v223_v18 }
  0x29   : > { %564 = vmatpush3.msra.mxu1 %v223_v18 }
  0x2a   : > { %565 = vmatprep.subr.mxu1 %v222_v19 }
  0x2b   : > { %566 = vmatpush3.msra.mxu1 %v222_v19 }
  0xd4   : > { %v534_v20 = vpop.f32.mrf.mxu0 }
  0xd6   : > { %v312_v21 = vpop.f32.mrf.mxu0 }
  0xd7   : > { %567 = vmatprep.mubr.f32.mxu1 %v312_v21 }
  0xd8   : > { %568 = vmatmul.mubr.f32.vlgmr.msra.gmra.mxu1 %v534_v20 }
 0x198   : > { %v569_v22 = vpop.f32.mrf.mxu1 }
 0x199   : > { %v403_v26 = vadd.f32 %v569_v22, %v500_v23 }
 0x19a   : > { %v387_v24 = vpop.f32.mrf.mxu1 }
 0x19b   : > { %v402_v25 = vadd.f32 %v500_v23, %v387_v24  ;;  %v405_v28 = vmul.f32 %v403_v26, %v403_v26 }
 0x19d   : > { %v404_v27 = vmul.f32 %v402_v25, %v402_v25 }
 0x19f   : > { %406 = vadd.xlane.f32.xlu0 %v404_v27 }
 0x1a3   : > { %408 = vadd.xlane.f32.xlu0 %v405_v28 }
 0x228   : > { %v407_v29 = vpop.xlane.xlu0 %406 }
 0x229   : > { %v410_v30 = vmax.f32 %v407_v29, 1e-24 }
 0x22b   : > { %578 = vrsqrt.f32 %v410_v30 }
 0x22c   : > { %v409_v31 = vpop.xlane.xlu0 %408 }
 0x22d   : > { %v411_v32 = vmax.f32 %v409_v31, 1e-24 }
 0x22f   : > { %580 = vrsqrt.f32 %v411_v32 }
 0x238   : > { %v579_v33 = vpop.eup %578 }
 0x239   : > { %v414_v34 = vmul.f32 %v579_v33, %v402_v25 }
 0x23b   : > { %v416_v35 = vmax.f32 %v414_v34, 0.0 }
 0x23c   : > { %v581_v36 = vpop.eup %580 }
 0x23d   : > { %418 = vst [vmem:[%s217_s10] sm:$0xff] %v416_v35  ;;  %v415_v37 = vmul.f32 %v581_v36, %v403_v26 }
 0x23f   : > { %v417_v38 = vmax.f32 %v415_v37, 0.0 }
 0x241   : > { %419 = vst [vmem:[%s217_s10 + $0x8] sm:$0xff] %v417_v38 }
 0x242 PF: > { %s14_s15 = sadd.s32 1, %s588_s15  }
 0x243   : > { %p11_p4 = scmp.ge.s32.totalorder %s14_s15, 4  }
 0x245   :  { %13 = sbr.rel (!%p11_p4) target bundleno = 1 (0x1), region = 69 }

</bundles_post_ra>
